<compile_context>
chip_gen: v7x
topology: tpu7x:2x2x1
jax: 0.10.0
libtpu: 0.0.40
codegen_flags: <defaults>
</compile_context>

<pallas_src>
import functools

import jax
import jax.numpy as jnp
from jax import lax
from jax.experimental import pallas as pl
from jax.experimental.pallas import tpu as pltpu


def _round_up(x, m):
    return ((x + m - 1) // m) * m


def _cdiv(a, b):
    return (a + b - 1) // b


# ----------------------------- Pallas kernel ---------------------------------

def _conv_head_kernel(x_ref, w1_ref, b1_ref, w2_ref, b2_ref, w3_ref, b3_ref,
                      o_ref, patch_ref, *, Wp, TL, Ck, n_lt):
    # x_ref    : (1, Ck, Lin)  bf16  last-k frames, channel-merged, zero-padded, flat
    # w1_ref   : (16, 9*Ck)    bf16  conv1 weights; columns ordered (kh,kw)-major, (C,kd)
    # b1_ref   : (16, 1) f32 ; w2_ref: (32, 16) bf16 ; b2_ref: (32, 1) f32
    # w3_ref   : (32, 1) f32 ; b3_ref: (1, 1)  f32
    # o_ref    : (1, 1, TL)    f32   lane-dense output tile
    # patch_ref: (9*Ck, TL)    bf16  VMEM scratch: im2col patch matrix for this tile
    TLIN = TL + 2 * Wp + 2                       # window incl. max tap offset

    if n_lt == 1:
        xwin = x_ref[0, :, 0:TLIN]               # fully static read
    else:
        l0 = pl.multiple_of(pl.program_id(1) * TL, 128)   # 128-aligned dynamic start
        xwin = x_ref[0, :, pl.ds(l0, TLIN)]

    # Build the patch matrix once (one copy per tap), then a single K=9*Ck matmul.
    for t in range(9):
        kh, kw = t // 3, t % 3
        off = kh * Wp + kw
        patch_ref[t * Ck:(t + 1) * Ck, :] = xwin[:, off:off + TL]

    z1 = jnp.dot(w1_ref[...], patch_ref[...],
                 preferred_element_type=jnp.float32) + b1_ref[...]        # (16, TL)
    h1 = jnp.maximum(z1, 0.0)

    z2 = jnp.dot(w2_ref[...], h1.astype(jnp.bfloat16),
                 preferred_element_type=jnp.float32) + b2_ref[...]        # (32, TL)
    h2 = jnp.maximum(z2, 0.0)

    # 32 -> 1 head: VPU multiply + sublane reduction (avoid a K=32, M=1 MXU matmul).
    logits = jnp.sum(h2 * w3_ref[...], axis=0, keepdims=True) + b3_ref[...]  # (1, TL)
    # sigmoid: exp on EUP, divide replaced by EUP approximate reciprocal.
    o_ref[0] = pl.reciprocal(1.0 + jnp.exp(-logits), approx=True)


# ----------------------------- wrapper (glue) ---------------------------------

def conv3d_predictor_forward(x, params, k, *, lanes_per_tile=8 * 1024):
    """x: (N, 3, D, H, W) float32 (NCDHW).  Returns net(x)[:, :, -1] -> (N, 1, H, W)."""
    W1, b1, W2, b2, W3, b3 = params
    N, C, D, H, W = x.shape
    assert D >= k
    out1 = W1.shape[0]
    Ck = C * k
    Hp, Wp = H + 2, W + 2
    Lvalid = H * Wp                                # valid output pixels live at h*Wp + w

    # Lane tiling of the flattened output row:
    #   (a) bounds per-step VMEM when H,W scale (v7x portability),
    #   (b) guarantees N * n_lt >= 2 parallel grid steps (both v7x TensorCores busy).
    n_lt = max(_cdiv(Lvalid, lanes_per_tile), 1)
    if N * n_lt < 2:
        n_lt = 2
    TL = _round_up(_cdiv(Lvalid, n_lt), 128)       # lane tile width (multiple of 128)
    Lout = n_lt * TL

    # Input flat length must cover the largest read: (n_lt-1)*TL + (2*Wp + 2) + TL.
    Lin_needed = Lout + 2 * Wp + 2
    rows_total = _cdiv(Lin_needed, Wp)             # >= H + 2  => bottom pad >= 1
    Lin = rows_total * Wp

    # Only the last output-depth position is kept -> only the last k input frames matter.
    # Single pad (spatial halo + extra bottom rows) + reshape + cast.
    x_last = x[:, :, D - k:, :, :]                                 # (N, C, k, H, W)
    xc = x_last.reshape(N, Ck, H, W)                               # merge (C, k)
    xp = jnp.pad(xc, ((0, 0), (0, 0), (1, rows_total - H - 1), (1, 1)))
    xf = xp.reshape(N, Ck, Lin).astype(jnp.bfloat16)               # (N, Ck, Lin)

    # conv1 weights -> (16, 9*Ck): columns (kh,kw)-major then (C,kd), matching patch rows.
    w1m = jnp.transpose(W1, (0, 3, 4, 1, 2)).reshape(out1, 9 * Ck).astype(jnp.bfloat16)
    b1m = b1.reshape(-1, 1).astype(jnp.float32)                    # (16, 1)
    w2m = W2.reshape(W2.shape[0], W2.shape[1]).astype(jnp.bfloat16)  # (32, 16)
    b2m = b2.reshape(-1, 1).astype(jnp.float32)                    # (32, 1)
    w3m = W3.reshape(-1, 1).astype(jnp.float32)                    # (32, 1)
    b3m = b3.reshape(1, 1).astype(jnp.float32)                     # (1, 1)

    wspec = lambda shp: pl.BlockSpec(shp, lambda n, l: (0, 0))     # VMEM-resident consts
    out_flat = pl.pallas_call(
        functools.partial(_conv_head_kernel, Wp=Wp, TL=TL, Ck=Ck, n_lt=n_lt),
        out_shape=jax.ShapeDtypeStruct((N, 1, Lout), jnp.float32),
        grid=(N, n_lt),
        in_specs=[
            # Whole padded image per step; index constant along the lane-tile axis so it
            # is not re-fetched between consecutive l-steps of the same image.
            pl.BlockSpec((1, Ck, Lin), lambda n, l: (n, 0, 0)),
            wspec(w1m.shape), wspec(b1m.shape),
            wspec(w2m.shape), wspec(b2m.shape),
            wspec(w3m.shape), wspec(b3m.shape),
        ],
        out_specs=pl.BlockSpec((1, 1, TL), lambda n, l: (n, 0, l)),
        scratch_shapes=[pltpu.VMEM((9 * Ck, TL), jnp.bfloat16)],
        compiler_params=pltpu.CompilerParams(
            dimension_semantics=("parallel", "parallel")),
    )(xf, w1m, b1m, w2m, b2m, w3m, b3m)

    # Valid pixels live at flat index h*Wp + w; the rest of each row is scratch.
    y = out_flat[:, 0, :Lvalid].reshape(N, H, Wp)[:, :, :W]
    return y[:, None, :, :]                                        # (N, 1, H, W)


# ----------------------------- reference (pure JAX) ----------------------------

def reference_forward(x, params, k):
    W1, b1, W2, b2, W3, b3 = params
    dn = lax.conv_dimension_numbers(x.shape, W1.shape, ("NCDHW", "OIDHW", "NCDHW"))
    h1 = lax.conv_general_dilated(x, W1, (1, 1, 1),
                                  [(0, 0), (1, 1), (1, 1)], dimension_numbers=dn)
    h1 = jnp.maximum(h1 + b1[None, :, None, None, None], 0.0)
    h2 = jnp.einsum("ncdhw,oc->nodhw", h1, W2[:, :, 0, 0, 0])
    h2 = jnp.maximum(h2 + b2[None, :, None, None, None], 0.0)
    h3 = jnp.einsum("ncdhw,oc->nodhw", h2, W3[:, :, 0, 0, 0])
    h3 = h3 + b3[None, :, None, None, None]
    return jax.nn.sigmoid(h3)[:, :, -1]                            # (N, 1, H, W)


# ----------------------------- main --------------------------------------------

if __name__ == "__main__":
    k = 4
    N, C, D, H, W = 2, 3, 8, 16, 16

    key = jax.random.PRNGKey(0)
    kx, k1, k2, k3, k4, k5, k6 = jax.random.split(key, 7)

    x = jax.random.normal(kx, (N, C, D, H, W), dtype=jnp.float32)

    # Deterministic synthetic parameters (shapes from the module's __init__).
    W1 = 0.1 * jax.random.normal(k1, (16, 3, k, 3, 3), dtype=jnp.float32)
    b1 = 0.1 * jax.random.normal(k2, (16,), dtype=jnp.float32)
    W2 = 0.1 * jax.random.normal(k3, (32, 16, 1, 1, 1), dtype=jnp.float32)
    b2 = 0.1 * jax.random.normal(k4, (32,), dtype=jnp.float32)
    W3 = 0.1 * jax.random.normal(k5, (1, 32, 1, 1, 1), dtype=jnp.float32)
    b3 = 0.1 * jax.random.normal(k6, (1,), dtype=jnp.float32)
    params = (W1, b1, W2, b2, W3, b3)

    fwd = jax.jit(functools.partial(conv3d_predictor_forward, k=k))
    y = fwd(x, params)
    jax.block_until_ready(y)

    y_ref = reference_forward(x, params, k)
    assert y.shape == (N, 1, H, W), y.shape
    err = float(jnp.max(jnp.abs(y - y_ref)))
    # bf16 matmuls + approx EUP reciprocal -> loosened tolerance (observed ~1e-3).
    assert err < 2e-2, err
    print("KERNEL_OK")
</pallas_src>

<mosaic_0001>
module attributes {stable_mosaic.version = 11 : i64} {
  func.func @_conv_head_kernel(%arg0: i32, %arg1: i32, %arg2: memref<1x12x432xbf16, #tpu.memory_space<vmem>>, %arg3: memref<16x108xbf16, #tpu.memory_space<vmem>>, %arg4: memref<16x1xf32, #tpu.memory_space<vmem>>, %arg5: memref<32x16xbf16, #tpu.memory_space<vmem>>, %arg6: memref<32x1xf32, #tpu.memory_space<vmem>>, %arg7: memref<32x1xf32, #tpu.memory_space<vmem>>, %arg8: memref<1x1xf32, #tpu.memory_space<vmem>>, %arg9: memref<1x1x384xf32, #tpu.memory_space<vmem>>, %arg10: memref<108x384xbf16, #tpu.memory_space<vmem>>) attributes {dimension_semantics = [#tpu.dimension_semantics<parallel>, #tpu.dimension_semantics<parallel>], iteration_bounds = array<i64: 2, 1>, scalar_prefetch = 0 : i64, scratch_operands = 1 : i64, tpu.core_type = #tpu.core_type<tc>, window_params = [{transform_indices = @transform_0, window_bounds = array<i64: 1, 12, 432>}, {pipeline_mode = #tpu.pipeline_mode<synchronous>, transform_indices = @transform_1, window_bounds = array<i64: 16, 108>}, {pipeline_mode = #tpu.pipeline_mode<synchronous>, transform_indices = @transform_2, window_bounds = array<i64: 16, 1>}, {pipeline_mode = #tpu.pipeline_mode<synchronous>, transform_indices = @transform_3, window_bounds = array<i64: 32, 16>}, {pipeline_mode = #tpu.pipeline_mode<synchronous>, transform_indices = @transform_4, window_bounds = array<i64: 32, 1>}, {pipeline_mode = #tpu.pipeline_mode<synchronous>, transform_indices = @transform_5, window_bounds = array<i64: 32, 1>}, {pipeline_mode = #tpu.pipeline_mode<synchronous>, transform_indices = @transform_6, window_bounds = array<i64: 1, 1>}, {transform_indices = @transform_7, window_bounds = array<i64: 1, 1, 384>}]} {
    %c0 = arith.constant 0 : index
    %c0_0 = arith.constant 0 : index
    %c0_1 = arith.constant 0 : index
    %0 = vector.load %arg2[%c0, %c0_0, %c0_1] : memref<1x12x432xbf16, #tpu.memory_space<vmem>>, vector<1x12x422xbf16>
    %1 = vector.shape_cast %0 : vector<1x12x422xbf16> to vector<12x422xbf16>
    %2 = vector.extract_strided_slice %1 {offsets = [0, 0], sizes = [12, 384], strides = [1, 1]} : vector<12x422xbf16> to vector<12x384xbf16>
    %c0_2 = arith.constant 0 : index
    %c0_3 = arith.constant 0 : index
    %3 = vector.load %arg10[%c0_2, %c0_3] : memref<108x384xbf16, #tpu.memory_space<vmem>>, vector<12x384xbf16>
    tpu.vector_store %arg10[%c0_2, %c0_3], %2 {strides = array<i32>} : memref<108x384xbf16, #tpu.memory_space<vmem>>, vector<12x384xbf16>,
    %4 = vector.extract_strided_slice %1 {offsets = [0, 1], sizes = [12, 384], strides = [1, 1]} : vector<12x422xbf16> to vector<12x384xbf16>
    %c12 = arith.constant 12 : index
    %c0_4 = arith.constant 0 : index
    %5 = vector.load %arg10[%c12, %c0_4] : memref<108x384xbf16, #tpu.memory_space<vmem>>, vector<12x384xbf16>
    tpu.vector_store %arg10[%c12, %c0_4], %4 {strides = array<i32>} : memref<108x384xbf16, #tpu.memory_space<vmem>>, vector<12x384xbf16>,
    %6 = vector.extract_strided_slice %1 {offsets = [0, 2], sizes = [12, 384], strides = [1, 1]} : vector<12x422xbf16> to vector<12x384xbf16>
    %c24 = arith.constant 24 : index
    %c0_5 = arith.constant 0 : index
    %7 = vector.load %arg10[%c24, %c0_5] : memref<108x384xbf16, #tpu.memory_space<vmem>>, vector<12x384xbf16>
    tpu.vector_store %arg10[%c24, %c0_5], %6 {strides = array<i32>} : memref<108x384xbf16, #tpu.memory_space<vmem>>, vector<12x384xbf16>,
    %8 = vector.extract_strided_slice %1 {offsets = [0, 18], sizes = [12, 384], strides = [1, 1]} : vector<12x422xbf16> to vector<12x384xbf16>
    %c36 = arith.constant 36 : index
    %c0_6 = arith.constant 0 : index
    %9 = vector.load %arg10[%c36, %c0_6] : memref<108x384xbf16, #tpu.memory_space<vmem>>, vector<12x384xbf16>
    tpu.vector_store %arg10[%c36, %c0_6], %8 {strides = array<i32>} : memref<108x384xbf16, #tpu.memory_space<vmem>>, vector<12x384xbf16>,
    %10 = vector.extract_strided_slice %1 {offsets = [0, 19], sizes = [12, 384], strides = [1, 1]} : vector<12x422xbf16> to vector<12x384xbf16>
    %c48 = arith.constant 48 : index
    %c0_7 = arith.constant 0 : index
    %11 = vector.load %arg10[%c48, %c0_7] : memref<108x384xbf16, #tpu.memory_space<vmem>>, vector<12x384xbf16>
    tpu.vector_store %arg10[%c48, %c0_7], %10 {strides = array<i32>} : memref<108x384xbf16, #tpu.memory_space<vmem>>, vector<12x384xbf16>,
    %12 = vector.extract_strided_slice %1 {offsets = [0, 20], sizes = [12, 384], strides = [1, 1]} : vector<12x422xbf16> to vector<12x384xbf16>
    %c60 = arith.constant 60 : index
    %c0_8 = arith.constant 0 : index
    %13 = vector.load %arg10[%c60, %c0_8] : memref<108x384xbf16, #tpu.memory_space<vmem>>, vector<12x384xbf16>
    tpu.vector_store %arg10[%c60, %c0_8], %12 {strides = array<i32>} : memref<108x384xbf16, #tpu.memory_space<vmem>>, vector<12x384xbf16>,
    %14 = vector.extract_strided_slice %1 {offsets = [0, 36], sizes = [12, 384], strides = [1, 1]} : vector<12x422xbf16> to vector<12x384xbf16>
    %c72 = arith.constant 72 : index
    %c0_9 = arith.constant 0 : index
    %15 = vector.load %arg10[%c72, %c0_9] : memref<108x384xbf16, #tpu.memory_space<vmem>>, vector<12x384xbf16>
    tpu.vector_store %arg10[%c72, %c0_9], %14 {strides = array<i32>} : memref<108x384xbf16, #tpu.memory_space<vmem>>, vector<12x384xbf16>,
    %16 = vector.extract_strided_slice %1 {offsets = [0, 37], sizes = [12, 384], strides = [1, 1]} : vector<12x422xbf16> to vector<12x384xbf16>
    %c84 = arith.constant 84 : index
    %c0_10 = arith.constant 0 : index
    %17 = vector.load %arg10[%c84, %c0_10] : memref<108x384xbf16, #tpu.memory_space<vmem>>, vector<12x384xbf16>
    tpu.vector_store %arg10[%c84, %c0_10], %16 {strides = array<i32>} : memref<108x384xbf16, #tpu.memory_space<vmem>>, vector<12x384xbf16>,
    %18 = vector.extract_strided_slice %1 {offsets = [0, 38], sizes = [12, 384], strides = [1, 1]} : vector<12x422xbf16> to vector<12x384xbf16>
    %c96 = arith.constant 96 : index
    %c0_11 = arith.constant 0 : index
    %19 = vector.load %arg10[%c96, %c0_11] : memref<108x384xbf16, #tpu.memory_space<vmem>>, vector<12x384xbf16>
    tpu.vector_store %arg10[%c96, %c0_11], %18 {strides = array<i32>} : memref<108x384xbf16, #tpu.memory_space<vmem>>, vector<12x384xbf16>,
    %c0_12 = arith.constant 0 : index
    %c0_13 = arith.constant 0 : index
    %20 = vector.load %arg3[%c0_12, %c0_13] : memref<16x108xbf16, #tpu.memory_space<vmem>>, vector<16x108xbf16>
    %c0_14 = arith.constant 0 : index
    %c0_15 = arith.constant 0 : index
    %21 = vector.load %arg10[%c0_14, %c0_15] : memref<108x384xbf16, #tpu.memory_space<vmem>>, vector<108x384xbf16>
    %cst = arith.constant dense<0.000000e+00> : vector<16x384xf32>
    %22 = tpu.matmul %20, %21, %cst {dimension_numbers = #tpu.dot_dimension_numbers<[1], [0], [0], [1], [0, 0, 1, 1], [], []>} : vector<16x108xbf16>, vector<108x384xbf16>, vector<16x384xf32> -> vector<16x384xf32>
    %c0_16 = arith.constant 0 : index
    %c0_17 = arith.constant 0 : index
    %23 = vector.load %arg4[%c0_16, %c0_17] : memref<16x1xf32, #tpu.memory_space<vmem>>, vector<16x1xf32>
    %24 = vector.broadcast %23 : vector<16x1xf32> to vector<16x384xf32>
    %25 = arith.addf %22, %24 : vector<16x384xf32>
    %cst_18 = arith.constant 0.000000e+00 : f32
    %26 = vector.broadcast %cst_18 : f32 to vector<16x384xf32>
    %27 = arith.maximumf %25, %26 : vector<16x384xf32>
    %c0_19 = arith.constant 0 : index
    %c0_20 = arith.constant 0 : index
    %28 = vector.load %arg5[%c0_19, %c0_20] : memref<32x16xbf16, #tpu.memory_space<vmem>>, vector<32x16xbf16>
    %29 = arith.truncf %27 : vector<16x384xf32> to vector<16x384xbf16>
    %cst_21 = arith.constant dense<0.000000e+00> : vector<32x384xf32>
    %30 = tpu.matmul %28, %29, %cst_21 {dimension_numbers = #tpu.dot_dimension_numbers<[1], [0], [0], [1], [0, 0, 1, 1], [], []>} : vector<32x16xbf16>, vector<16x384xbf16>, vector<32x384xf32> -> vector<32x384xf32>
    %c0_22 = arith.constant 0 : index
    %c0_23 = arith.constant 0 : index
    %31 = vector.load %arg6[%c0_22, %c0_23] : memref<32x1xf32, #tpu.memory_space<vmem>>, vector<32x1xf32>
    %32 = vector.broadcast %31 : vector<32x1xf32> to vector<32x384xf32>
    %33 = arith.addf %30, %32 : vector<32x384xf32>
    %cst_24 = arith.constant 0.000000e+00 : f32
    %34 = vector.broadcast %cst_24 : f32 to vector<32x384xf32>
    %35 = arith.maximumf %33, %34 : vector<32x384xf32>
    %c0_25 = arith.constant 0 : index
    %c0_26 = arith.constant 0 : index
    %36 = vector.load %arg7[%c0_25, %c0_26] : memref<32x1xf32, #tpu.memory_space<vmem>>, vector<32x1xf32>
    %37 = vector.broadcast %36 : vector<32x1xf32> to vector<32x384xf32>
    %38 = arith.mulf %35, %37 : vector<32x384xf32>
    %cst_27 = arith.constant dense<0.000000e+00> : vector<384xf32>
    %39 = vector.multi_reduction <add>, %38, %cst_27 [0] : vector<32x384xf32> to vector<384xf32>
    %40 = vector.shape_cast %39 : vector<384xf32> to vector<1x384xf32>
    %c0_28 = arith.constant 0 : index
    %c0_29 = arith.constant 0 : index
    %41 = vector.load %arg8[%c0_28, %c0_29] : memref<1x1xf32, #tpu.memory_space<vmem>>, vector<1x1xf32>
    %42 = vector.broadcast %41 : vector<1x1xf32> to vector<1x384xf32>
    %43 = arith.addf %40, %42 : vector<1x384xf32>
    %cst_30 = arith.constant 0.000000e+00 : f32
    %44 = vector.broadcast %cst_30 : f32 to vector<1x384xf32>
    %45 = arith.subf %44, %43 : vector<1x384xf32>
    %46 = math.exp %45 : vector<1x384xf32>
    %cst_31 = arith.constant 1.000000e+00 : f32
    %47 = vector.broadcast %cst_31 : f32 to vector<1x384xf32>
    %48 = arith.addf %47, %46 : vector<1x384xf32>
    %49 = tpu.reciprocal %48 {approx = true} : vector<1x384xf32> -> vector<1x384xf32>
    %c0_32 = arith.constant 0 : index
    %c0_33 = arith.constant 0 : index
    %c0_34 = arith.constant 0 : index
    %50 = vector.load %arg9[%c0_32, %c0_33, %c0_34] : memref<1x1x384xf32, #tpu.memory_space<vmem>>, vector<1x1x384xf32>
    %51 = vector.shape_cast %50 : vector<1x1x384xf32> to vector<1x384xf32>
    %52 = vector.shape_cast %49 : vector<1x384xf32> to vector<1x1x384xf32>
    tpu.vector_store %arg9[%c0_32, %c0_33, %c0_34], %52 {strides = array<i32>} : memref<1x1x384xf32, #tpu.memory_space<vmem>>, vector<1x1x384xf32>,
    return
  }
  func.func @transform_0(%arg0: i32, %arg1: i32) -> (i32, i32, i32) {
    %c0_i32 = arith.constant 0 : i32
    %c0_i32_0 = arith.constant 0 : i32
    %c0_i32_1 = arith.constant 0 : i32
    return %arg0, %c0_i32, %c0_i32_0 : i32, i32, i32
  }
  func.func @transform_1(%arg0: i32, %arg1: i32) -> (i32, i32) {
    %c0_i32 = arith.constant 0 : i32
    %c0_i32_0 = arith.constant 0 : i32
    %c0_i32_1 = arith.constant 0 : i32
    return %c0_i32, %c0_i32_0 : i32, i32
  }
  func.func @transform_2(%arg0: i32, %arg1: i32) -> (i32, i32) {
    %c0_i32 = arith.constant 0 : i32
    %c0_i32_0 = arith.constant 0 : i32
    %c0_i32_1 = arith.constant 0 : i32
    return %c0_i32, %c0_i32_0 : i32, i32
  }
  func.func @transform_3(%arg0: i32, %arg1: i32) -> (i32, i32) {
    %c0_i32 = arith.constant 0 : i32
    %c0_i32_0 = arith.constant 0 : i32
    %c0_i32_1 = arith.constant 0 : i32
    return %c0_i32, %c0_i32_0 : i32, i32
  }
  func.func @transform_4(%arg0: i32, %arg1: i32) -> (i32, i32) {
    %c0_i32 = arith.constant 0 : i32
    %c0_i32_0 = arith.constant 0 : i32
    %c0_i32_1 = arith.constant 0 : i32
    return %c0_i32, %c0_i32_0 : i32, i32
  }
  func.func @transform_5(%arg0: i32, %arg1: i32) -> (i32, i32) {
    %c0_i32 = arith.constant 0 : i32
    %c0_i32_0 = arith.constant 0 : i32
    %c0_i32_1 = arith.constant 0 : i32
    return %c0_i32, %c0_i32_0 : i32, i32
  }
  func.func @transform_6(%arg0: i32, %arg1: i32) -> (i32, i32) {
    %c0_i32 = arith.constant 0 : i32
    %c0_i32_0 = arith.constant 0 : i32
    %c0_i32_1 = arith.constant 0 : i32
    return %c0_i32, %c0_i32_0 : i32, i32
  }
  func.func @transform_7(%arg0: i32, %arg1: i32) -> (i32, i32, i32) {
    %c0_i32 = arith.constant 0 : i32
    %c0_i32_0 = arith.constant 0 : i32
    return %arg0, %c0_i32, %arg1 : i32, i32, i32
  }
}

</mosaic_0001>

<bundles_post_ra>
// kernel: squeeze.1
= control target key start
LH: loop header
LB: loop body
LE: loop exit
PB: predicated region body
PF: predicated region fallthrough
CT: control target
= control target key end

     0   :  { %vm107_vm0 = vcmask 1014784   ;;  %s166_s12 = smov 114   ;;  %vm120_vm1 = vcmask 1031168   ;;  %s167_s13 = smov 4   ;;  %vm16_vm2 = vcmask 146432   ;;  %vm111_vm3 = vcmask 31744   ;;  %s267_s0 = inlined_call_operand.vmem [shape: f32[2,288], index: 0, kind: input, shape index: {}]   ;;  %s268_s1 = inlined_call_operand.vmem [shape: f32[2,16,18], index: 1, kind: output, shape index: {}]  }
   0x1   :  { %v13_v0 = vld [vmem:[%s267_s0] sm:$0x3]  ;;  %v131_v1 = vld [vmem:[%s267_s0 + $0x4] sm:$0x3]  ;;  %v132_v2 = vld [vmem:[%s267_s0 + $0x2] sm:$0x3] }
   0x2   :  { %14 = vst [vmem:[#allocation0] sm:$0x3] %v13_v0  ;;  %8 = vst [vmem:[#allocation0 + $0x10] sm:$0x3] %v131_v1  ;;  %s165_s0 = smov 110   ;;  %s168_s14 = smov 112  }
   0x3   :  { %12 = vst [vmem:[#allocation0 + $0x8] sm:$0x3] %v132_v2  ;;  %s169_s17 = smov 2   ;;  %s170_s18 = smov 94   ;;  %vm114_vm4 = vcmask 146464   ;;  %vm124_vm5 = vcmask 15360  }
   0x4   :  { %s171_s19 = smov 92   ;;  %s172_s20 = smov 76   ;;  %vm127_vm6 = vcmask 146448  }
   0x5   :  { %s173_s21 = smov 74   ;;  %s174_s22 = smov 58  }
   0x6   :  { %s175_s23 = smov 56   ;;  %s176_s24 = smov 40  }
   0x7   :  { %s177_s25 = smov 38   ;;  %s178_s26 = smov 22  }
   0x8   :  { %s179_s27 = smov 20  }
   0x9   :  { %v32_v3 = vld [vmem:[#allocation0] sm:$0x3]   ;;  %v106_v4 = vld [vmem:[#allocation0 + $0x10] sm:$0x3]  }
   0xa   :  { %v19_v5 = vld [vmem:[#allocation0 + $0x10] sm:$0x3]   ;;  %33 = vrot.lane.b32.xlu0 %v32_v3, %s165_s0  ;;  %v104_v6 = vld [vmem:[#allocation0 + $0x8] sm:$0x3]   ;;  %v117_v9 = vld [vmem:[#allocation0] sm:$0x3]  }
   0xb   :  { %20 = vrot.lane.b32.xlu1 %v19_v5, %s166_s12  ;;  %v108_v7 = vsel %vm107_vm0, %v106_v4, %v104_v6  ;;  %v26_v8 = vld [vmem:[#allocation0 + $0x8] sm:$0x3]   ;;  %v15_v11 = vld [vmem:[#allocation0] sm:$0x3]  }
   0xc   :  { %v119_v10 = vld [vmem:[#allocation0 + $0x8] sm:$0x3]   ;;  %17 = vst.msk [vmem:[%s268_s1] ss:$16 sm:$0x3] %vm16_vm2, %v15_v11  }
   0xd   :  { %v121_v12 = vsel %vm120_vm1, %v119_v10, %v117_v9  ;;  %v39_v13 = vld [vmem:[#allocation0 + $0x8] sm:$0x3]   ;;  %v45_v14 = vld [vmem:[#allocation0] sm:$0x3]  }
   0xe   :  { %109 = vrot.lane.b32.xlu0 %v108_v7, %s167_s13  ;;  %v52_v15 = vld [vmem:[#allocation0 + $0x8] sm:$0x3]   ;;  %v58_v16 = vld [vmem:[#allocation0] sm:$0x3]  }
   0xf   :  { %27 = vrot.lane.b32.xlu1 %v26_v8, %s168_s14  ;;  %v65_v17 = vld [vmem:[#allocation0 + $0x8] sm:$0x3]   ;;  %v71_v18 = vld [vmem:[#allocation0] sm:$0x3]  }
  0x10   :  { %v78_v19 = vld [vmem:[#allocation0 + $0x8] sm:$0x3]   ;;  %v84_v20 = vld [vmem:[#allocation0] sm:$0x3]  }
  0x11   :  { %v91_v21 = vld [vmem:[#allocation0 + $0x8] sm:$0x3]   ;;  %v97_v22 = vld [vmem:[#allocation0] sm:$0x3]  }
  0x12   :  { %122 = vrot.lane.b32.xlu0 %v121_v12, %s169_s17 }
  0x13   :  { %40 = vrot.lane.b32.xlu1 %v39_v13, %s170_s18 }
  0x16   :  { %46 = vrot.lane.b32.xlu0 %v45_v14, %s171_s19 }
  0x17   :  { %53 = vrot.lane.b32.xlu1 %v52_v15, %s172_s20 }
  0x1a   :  { %59 = vrot.lane.b32.xlu0 %v58_v16, %s173_s21 }
  0x1b   :  { %66 = vrot.lane.b32.xlu1 %v65_v17, %s174_s22 }
  0x1e   :  { %72 = vrot.lane.b32.xlu0 %v71_v18, %s175_s23 }
  0x1f   :  { %79 = vrot.lane.b32.xlu1 %v78_v19, %s176_s24 }
  0x22   :  { %85 = vrot.lane.b32.xlu0 %v84_v20, %s177_s25 }
  0x23   :  { %92 = vrot.lane.b32.xlu1 %v91_v21, %s178_s26 }
  0x26   :  { %98 = vrot.lane.b32.xlu0 %v97_v22, %s179_s27 }
  0x7c   :  { %v34_v23 = vpop.permute.xlu0 %33  }
  0x7d   :  { %v21_v24 = vpop.permute.xlu1 %20   ;;  %135 = vst.msk [vmem:[%s268_s1 + $0x1] ss:$16 sm:$0x3] %vm16_vm2, %v34_v23  }
  0x7e   :  { %133 = vst.msk [vmem:[%s268_s1 + $0xf] ss:$16 sm:$0x3] %vm16_vm2, %v21_v24  }
  0x80   :  { %v110_v25 = vpop.permute.xlu0 %109  }
  0x81   :  { %v28_v26 = vpop.permute.xlu1 %27   ;;  %146 = vst.msk [vmem:[%s268_s1 + $0xe] ss:$16 sm:$0x3] %vm111_vm3, %v110_v25  }
  0x82   :  { %134 = vst.msk [vmem:[%s268_s1 + $0x8] ss:$16 sm:$0x3] %vm16_vm2, %v28_v26  }
  0x83   :  { %147 = vst.msk [vmem:[%s268_s1 + $0xe] ss:$16 sm:$0x3] %vm114_vm4, %v110_v25  }
  0x84   :  { %v123_v27 = vpop.permute.xlu0 %122  }
  0x85   :  { %v41_v28 = vpop.permute.xlu1 %40   ;;  %148 = vst.msk [vmem:[%s268_s1 + $0x7] ss:$16 sm:$0x3] %vm124_vm5, %v123_v27  }
  0x86   :  { %136 = vst.msk [vmem:[%s268_s1 + $0x9] ss:$16 sm:$0x3] %vm16_vm2, %v41_v28  }
  0x87   :  { %149 = vst.msk [vmem:[%s268_s1 + $0x7] ss:$16 sm:$0x3] %vm127_vm6, %v123_v27  }
  0x88   :  { %v47_v29 = vpop.permute.xlu0 %46  }
  0x89   :  { %v54_v30 = vpop.permute.xlu1 %53   ;;  %137 = vst.msk [vmem:[%s268_s1 + $0x2] ss:$16 sm:$0x3] %vm16_vm2, %v47_v29  }
  0x8a   :  { %138 = vst.msk [vmem:[%s268_s1 + $0xa] ss:$16 sm:$0x3] %vm16_vm2, %v54_v30  }
  0x8c   :  { %v60_v31 = vpop.permute.xlu0 %59  }
  0x8d   :  { %v67_v32 = vpop.permute.xlu1 %66   ;;  %139 = vst.msk [vmem:[%s268_s1 + $0x3] ss:$16 sm:$0x3] %vm16_vm2, %v60_v31  }
  0x8e   :  { %140 = vst.msk [vmem:[%s268_s1 + $0xb] ss:$16 sm:$0x3] %vm16_vm2, %v67_v32  }
  0x90   :  { %v73_v33 = vpop.permute.xlu0 %72  }
  0x91   :  { %v80_v34 = vpop.permute.xlu1 %79   ;;  %141 = vst.msk [vmem:[%s268_s1 + $0x4] ss:$16 sm:$0x3] %vm16_vm2, %v73_v33  }
  0x92   :  { %142 = vst.msk [vmem:[%s268_s1 + $0xc] ss:$16 sm:$0x3] %vm16_vm2, %v80_v34  }
  0x94   :  { %v86_v35 = vpop.permute.xlu0 %85  }
  0x95   :  { %v93_v36 = vpop.permute.xlu1 %92   ;;  %143 = vst.msk [vmem:[%s268_s1 + $0x5] ss:$16 sm:$0x3] %vm16_vm2, %v86_v35  }
  0x96   :  { %144 = vst.msk [vmem:[%s268_s1 + $0xd] ss:$16 sm:$0x3] %vm16_vm2, %v93_v36  }
  0x98   :  { %v99_v37 = vpop.permute.xlu0 %98  }
  0x99   :  { %145 = vst.msk [vmem:[%s268_s1 + $0x6] ss:$16 sm:$0x3] %vm16_vm2, %v99_v37  }

// kernel: conv3d_predictor_forward.1
= control target key start
LH: loop header
LB: loop body
LE: loop exit
PB: predicated region body
PF: predicated region fallthrough
CT: control target
= control target key end

     0   :  { %s1379_s26 = smov 0   ;;  %s1381_s27 = smov 0   ;;  %s1541_s0 = inlined_call_operand.vmem [shape: bf16[2,12,432], index: 0, kind: input, shape index: {}]   ;;  %s1542_s1 = inlined_call_operand.vmem [shape: bf16[16,108], index: 1, kind: input, shape index: {}]   ;;  %s1543_s2 = inlined_call_operand.vmem [shape: f32[16,1], index: 2, kind: input, shape index: {}]   ;;  %s1544_s3 = inlined_call_operand.vmem [shape: bf16[32,16], index: 3, kind: input, shape index: {}]   ;;  %s1545_s4 = inlined_call_operand.vmem [shape: f32[32,1], index: 4, kind: input, shape index: {}]   ;;  %s1546_s5 = inlined_call_operand.vmem [shape: f32[32,1], index: 5, kind: input, shape index: {}]   ;;  %s1547_s6 = inlined_call_operand.<no memory space> [shape: f32[1,1], index: 6, kind: input, shape index: {}]   ;;  %s1548_s7 = inlined_call_operand.vmem [shape: f32[2,1,384], index: 7, kind: output, shape index: {}]  }
   0x1   :  { %v12_v0 = vstv %s1547_s6  ;;  %s1383_s28 = smov 0  }
   0x2   :  { %13 = vst [vmem:[#allocation3] sm:$0x1] %v12_v0 }
   0x3 LB: > { %s31_s6 = sadd.s32 1, %s1318_s27  ;;  %p1167_p0 = scmp.ge.s32.totalorder %s1322_s28, 1  ;;  %s1322_s28 = sphi %s1383_s28, %s19_s28   ;;  %s1318_s27 = sphi %s1381_s27, %s1550_s27   ;;  %s1314_s26 = sphi %s1379_s26, %s1549_s26  }
   0x4   : > { %p33_p1 = scmp.ge.s32.totalorder %s31_s6, 2  ;;  %p253_p2 = scmp.lt.s32.totalorder %s1322_s28, 3 }
   0x6   : > { %s1552_s6 = smov (%p33_p1, %s31_s6), 0  ;;  %p254_p3 = pnand %p1167_p0, %p253_p2 }
   0x7   : > { %p288_p4 = scmp.lt.s32.totalorder (!%p254_p3), %s1314_s26, 1  ;;  %vm315_vm0 = vcmask (!%p254_p3), 1041408   ;;  %vm316_vm1 = vcmask (!%p254_p3), 1045508   ;;  %s1324_s10 = smov (!%p254_p3), 126   ;;  %v1326_v12 = vmov (!%p254_p3), 0.0   ;;  %vm1333_vm3 = vmmov (!%p254_p3), 0  }
   0x8   : > { %257 = sbr.rel (%p254_p3) target bundleno = 719 (0x2cf), region = 48  ;;  %vm317_vm2 = vmor (!%p254_p3), %vm315_vm0, %vm316_vm1  ;;  %s1325_s11 = smov (!%p254_p3), 127   ;;  %1215 = vmatprep.subr.bf16.mxu1 (!%p254_p3), %v1326_v12  ;;  %1229 = vmatprep.mubr.msk.bf16.mxu1 (!%p254_p3), %vm1333_vm3, %v1326_v12  ;;  %v1334_v14 = vmov (!%p254_p3), 0   ;;  %v574_v15 = vld [vmem:[%s1543_s2 + $0x8] sm:$0xff] (!%p254_p3)  ;;  %v573_v16 = vld [vmem:[%s1543_s2] sm:$0xff] (!%p254_p3)  ;;  %vm367_vm4 = vcmask (!%p254_p3), 1031168  }
   0x9   : > { %s1327_s12 = smov (!%p254_p3), 110   ;;  %s1328_s13 = smov (!%p254_p3), 109   ;;  %745 = vmatprep.mubr.bf16.mxu0 (!%p254_p3), %v1334_v14  ;;  %1277 = vset.pattern.permute.xlu1 (!%p254_p3), %v1334_v14  ;;  %v810_v17 = vld [vmem:[%s1545_s4] sm:$0xff] (!%p254_p3)  ;;  %v811_v18 = vld [vmem:[%s1545_s4 + $0x8] sm:$0xff] (!%p254_p3)  ;;  %v812_v19 = vld [vmem:[%s1545_s4 + $0x10] sm:$0xff] (!%p254_p3)  ;;  %vm338_vm5 = vcmask (!%p254_p3), 1043456  }
   0xa   : > { %s1329_s14 = smov (!%p254_p3), 108   ;;  %s1330_s15 = smov (!%p254_p3), 92   ;;  %1276 = vset.pattern.permute.xlu0 (!%p254_p3), %v1334_v14  ;;  %v813_v20 = vld [vmem:[%s1545_s4 + $0x18] sm:$0xff] (!%p254_p3)  ;;  %v965_v21 = vld [vmem:[%s1546_s5] sm:$0xff] (!%p254_p3)  ;;  %v966_v22 = vld [vmem:[%s1546_s5 + $0x8] sm:$0xff] (!%p254_p3)  ;;  %vm340_vm6 = vcmask (!%p254_p3), 1039360  }
   0xb   : > { %s1331_s16 = smov (!%p254_p3), 91   ;;  %s1332_s17 = smov (!%p254_p3), 90   ;;  %v967_v23 = vld [vmem:[%s1546_s5 + $0x10] sm:$0xff] (!%p254_p3)  ;;  %v968_v24 = vld [vmem:[%s1546_s5 + $0x18] sm:$0xff] (!%p254_p3)  ;;  %v1028_v25 = vld [vmem:[#allocation3] sm:$0x1] (!%p254_p3) }
   0xc   : > { %vm394_vm7 = vcmask (!%p254_p3), 900096   ;;  %vm421_vm8 = vcmask (!%p254_p3), 891904   ;;  %vm448_vm9 = vcmask (!%p254_p3), 883712   ;;  %vm475_vm10 = vcmask (!%p254_p3), 752640  }
   0xd   : > { %vm502_vm11 = vcmask (!%p254_p3), 744448   ;;  %vm529_vm12 = vcmask (!%p254_p3), 736256   ;;  %vm703_vm13 = vcmask (!%p254_p3), 1045504   ;;  %vm844_vm14 = vcmask (!%p254_p3), 130048  }
   0xf   : > { %s1554_s26 = smov (!%p288_p4, %s1314_s26), 1 }
  0x10   : > { %s1203_s29 = sshll.u32 %s1554_s26, 5  ;;  %s1239_s24 = smul.u32 3, %s1554_s26 }
  0x11   : > { %s292_s9 = scalar_lea.vmem %s1541_s0, %s1203_s29 }
  0x12   : > { %v304_v1 = vld [vmem:[%s292_s9 + $0x8] sm:$0xff]  ;;  %v305_v2 = vld [vmem:[%s292_s9 + $0x10] sm:$0x33]  ;;  %v1403_v3 = vld [vmem:[%s292_s9] sm:$0xff]  ;;  %s300_s30 = scalar_lea.vmem %s1548_s7, %s1239_s24 }
  0x13   : > { %309 = vst [vmem:[#allocation2 + $0xc] sm:$0x33] %v305_v2  ;;  %356 = vrot.lane.b32.xlu1 %v304_v1, %s1324_s10  ;;  %308 = vst [vmem:[#allocation2 + $0x8] sm:$0xf] %v304_v1  ;;  %354 = vrot.lane.b32.xlu0 %v1403_v3, %s1324_s10  ;;  %v306_v4 = vld [vmem:[%s292_s9 + $0x18] sm:$0x33] }
  0x14   : > { %v318_v5 = vrot.slane %v1403_v3, 6  ;;  %310 = vst [vmem:[#allocation2 + $0x14] sm:$0x3] %v306_v4  ;;  %v319_v6 = vrot.slane %v304_v1, 6  ;;  %v321_v7 = vrot.slane %v305_v2, 6  ;;  %v324_v11 = vrot.slane %v306_v4, 6 }
  0x16   : > { %v320_v8 = vrot.slane %v318_v5, 4  ;;  %v323_v10 = vrot.slane %v319_v6, 4 }
  0x17   : > { %360 = vrot.lane.b32.xlu1 %v306_v4, %s1324_s10  ;;  %326 = vrot.lane.b32.xlu0 %v318_v5, %s1325_s11 }
  0x18   : > { %v322_v9 = vsel %vm317_vm2, %v320_v8, %v321_v7  ;;  %v325_v13 = vsel %vm317_vm2, %v323_v10, %v324_v11 }
  0x1b   : > { %328 = vrot.lane.b32.xlu0 %v319_v6, %s1325_s11  ;;  %330 = vrot.lane.b32.xlu1 %v322_v9, %s1325_s11 }
  0x1f   : > { %358 = vrot.lane.b32.xlu0 %v305_v2, %s1324_s10  ;;  %332 = vrot.lane.b32.xlu1 %v325_v13, %s1325_s11 }
  0x23   : > { %381 = vrot.lane.b32.xlu0 %v318_v5, %s1327_s12  ;;  %383 = vrot.lane.b32.xlu1 %v319_v6, %s1327_s12 }
  0x27   : > { %385 = vrot.lane.b32.xlu0 %v322_v9, %s1327_s12  ;;  %387 = vrot.lane.b32.xlu1 %v325_v13, %s1327_s12 }
  0x2b   : > { %408 = vrot.lane.b32.xlu0 %v1403_v3, %s1328_s13  ;;  %410 = vrot.lane.b32.xlu1 %v304_v1, %s1328_s13 }
  0x2f   : > { %412 = vrot.lane.b32.xlu0 %v305_v2, %s1328_s13  ;;  %414 = vrot.lane.b32.xlu1 %v306_v4, %s1328_s13 }
  0x33   : > { %435 = vrot.lane.b32.xlu0 %v318_v5, %s1329_s14  ;;  %437 = vrot.lane.b32.xlu1 %v319_v6, %s1329_s14 }
  0x37   : > { %439 = vrot.lane.b32.xlu0 %v322_v9, %s1329_s14  ;;  %441 = vrot.lane.b32.xlu1 %v325_v13, %s1329_s14 }
  0x3b   : > { %462 = vrot.lane.b32.xlu0 %v1403_v3, %s1330_s15  ;;  %464 = vrot.lane.b32.xlu1 %v304_v1, %s1330_s15 }
  0x3f   : > { %466 = vrot.lane.b32.xlu0 %v305_v2, %s1330_s15  ;;  %468 = vrot.lane.b32.xlu1 %v306_v4, %s1330_s15 }
  0x43   : > { %489 = vrot.lane.b32.xlu0 %v318_v5, %s1331_s16  ;;  %491 = vrot.lane.b32.xlu1 %v319_v6, %s1331_s16 }
  0x47   : > { %493 = vrot.lane.b32.xlu0 %v322_v9, %s1331_s16  ;;  %495 = vrot.lane.b32.xlu1 %v325_v13, %s1331_s16 }
  0x4b   : > { %516 = vrot.lane.b32.xlu0 %v1403_v3, %s1332_s17  ;;  %518 = vrot.lane.b32.xlu1 %v304_v1, %s1332_s17 }
  0x4f   : > { %520 = vrot.lane.b32.xlu0 %v305_v2, %s1332_s17  ;;  %522 = vrot.lane.b32.xlu1 %v306_v4, %s1332_s17 }
  0x53   : > { %582 = vperm.xlu1 %1277, %v574_v15   ;;  %577 = vperm.xlu0 %1276, %v573_v16  }
  0x57   : > { %816 = vperm.xlu1 %1277, %v810_v17   ;;  %821 = vperm.xlu0 %1276, %v811_v18  }
  0x5b   : > { %826 = vperm.xlu1 %1277, %v812_v19   ;;  %831 = vperm.xlu0 %1276, %v813_v20  }
  0x5f   : > { %971 = vperm.xlu1 %1277, %v965_v21   ;;  %976 = vperm.xlu0 %1276, %v966_v22  }
  0x63   : > { %981 = vperm.xlu1 %1277, %v967_v23   ;;  %986 = vperm.xlu0 %1276, %v968_v24  }
  0x67   : > { %1031 = vperm.xlu1 %1277, %v1028_v25  }
  0x85   : > { %v357_v26 = vpop.permute.xlu1 %356  ;;  %v355_v27 = vpop.permute.xlu0 %354 }
  0x86   : > { %v363_v28 = vrot.slane %v357_v26, 4  ;;  %v362_v29 = vrot.slane %v355_v27, 4 }
  0x88   : > { %v369_v30 = vsel %vm367_vm4, %v357_v26, %v363_v28  ;;  %v366_v31 = vsel %vm338_vm5, %v362_v29, %v363_v28 }
  0x89   : > { %378 = vst [vmem:[#allocation2 + $0x2c] sm:$0xf] %v369_v30  ;;  %v1448_v32 = vsel %vm367_vm4, %v355_v27, %v366_v31  ;;  %v361_v33 = vpop.permute.xlu1 %360  ;;  %v327_v34 = vpop.permute.xlu0 %326 }
  0x8a   : > { %v365_v35 = vrot.slane %v361_v33, 4  ;;  %v334_v39 = vrot.slane %v327_v34, 4 }
  0x8c   : > { %v372_v36 = vsel %vm367_vm4, %v361_v33, %v365_v35 }
  0x8d   : > { %380 = vst [vmem:[#allocation2 + $0x38] sm:$0x3] %v372_v36  ;;  %v329_v37 = vpop.permute.xlu0 %328  ;;  %v331_v38 = vpop.permute.xlu1 %330 }
  0x8e   : > { %v335_v40 = vrot.slane %v329_v37, 4  ;;  %v336_v46 = vrot.slane %v331_v38, 4 }
  0x90   : > { %v339_v41 = vsel %vm338_vm5, %v334_v39, %v335_v40  ;;  %v342_v42 = vsel %vm340_vm6, %v329_v37, %v335_v40 }
  0x91   : > { %v341_v43 = vsel %vm340_vm6, %v327_v34, %v339_v41  ;;  %351 = vst [vmem:[#allocation2 + $0x14] sm:$0xc] %v342_v42  ;;  %v359_v44 = vpop.permute.xlu0 %358  ;;  %v333_v45 = vpop.permute.xlu1 %332 }
  0x92   : > { %350 = vst [vmem:[#allocation2 + $0xc] sm:$0xcc] %v341_v43  ;;  %v364_v47 = vrot.slane %v359_v44, 4  ;;  %v337_v48 = vrot.slane %v333_v45, 4 }
  0x94   : > { %v370_v49 = vsel %vm338_vm5, %v364_v47, %v365_v35  ;;  %v343_v50 = vsel %vm338_vm5, %v336_v46, %v337_v48  ;;  %v345_v51 = vsel %vm340_vm6, %v333_v45, %v337_v48 }
  0x95   : > { %v371_v52 = vsel %vm367_vm4, %v359_v44, %v370_v49  ;;  %v344_v53 = vsel %vm340_vm6, %v331_v38, %v343_v50  ;;  %353 = vst [vmem:[#allocation2 + $0x20] sm:$0xf] %v345_v51  ;;  %v382_v54 = vpop.permute.xlu0 %381  ;;  %v384_v55 = vpop.permute.xlu1 %383 }
  0x96   : > { %379 = vst [vmem:[#allocation2 + $0x30] sm:$0x33] %v371_v52  ;;  %v389_v56 = vrot.slane %v382_v54, 4  ;;  %v390_v57 = vrot.slane %v384_v55, 4  ;;  %v1175_v9 = vcombine.high %v344_v53, %v1448_v32 }
  0x98   : > { %v393_v58 = vsel %vm338_vm5, %v389_v56, %v390_v57  ;;  %v396_v59 = vsel %vm394_vm7, %v384_v55, %v390_v57  ;;  %v1278_v60 = vld [vmem:[#allocation2 + $0x8] ss:$12 sps:$4 sm:$0xff]  }
  0x99   : > { %v395_v61 = vsel %vm394_vm7, %v382_v54, %v393_v58  ;;  %405 = vst [vmem:[#allocation2 + $0x38] sm:$0xc] %v396_v59  ;;  %v386_v62 = vpop.permute.xlu0 %385  ;;  %v388_v63 = vpop.permute.xlu1 %387  ;;  %v547_v0 = vld [vmem:[#allocation2 + $0xc] sm:$0xff]  ;;  %1216 = vmatpush3.bf16.msra.mxu1 %v1278_v60 }
  0x9a   : > { %404 = vst [vmem:[#allocation2 + $0x30] sm:$0xcc] %v395_v61  ;;  %v391_v1 = vrot.slane %v386_v62, 4  ;;  %v392_v2 = vrot.slane %v388_v63, 4  ;;  %v1172_v4 = vcombine.high %v1403_v3, %v547_v0  ;;  %v1171_v5 = vcombine.low %v1403_v3, %v547_v0  ;;  %1217 = vmatprep.subr.bf16.mxu1 %v1326_v12 }
  0x9b   : > { %v1174_v3 = vcombine.low %v344_v53, %v1448_v32 }
  0x9c   : > { %v397_v6 = vsel %vm338_vm5, %v391_v1, %v392_v2  ;;  %v399_v7 = vsel %vm394_vm7, %v388_v63, %v392_v2  ;;  %713 = vmatprep.subr.bf16.mxu0 %v1172_v4  ;;  %v1279_v8 = vld [vmem:[#allocation2 + $0x20] ss:$12 sps:$4 sm:$0xff]  }
  0x9d   : > { %v398_v10 = vsel %vm394_vm7, %v386_v62, %v397_v6  ;;  %407 = vst [vmem:[#allocation2 + $0x44] sm:$0xf] %v399_v7  ;;  %v409_v11 = vpop.permute.xlu0 %408  ;;  %v411_v13 = vpop.permute.xlu1 %410  ;;  %714 = vmatpush1.bf16.msra.mxu0 %v1171_v5  ;;  %1218 = vmatpush3.bf16.msra.mxu1 %v1279_v8 }
  0x9e   : > { %v416_v15 = vrot.slane %v409_v11, 4  ;;  %v417_v16 = vrot.slane %v411_v13, 4  ;;  %715 = vmatprep.subr.bf16.mxu0 %v1175_v9  ;;  %1219 = vmatprep.subr.bf16.mxu1 %v1326_v12 }
  0xa0   : > { %v420_v17 = vsel %vm338_vm5, %v416_v15, %v417_v16  ;;  %v423_v18 = vsel %vm421_vm8, %v411_v13, %v417_v16 }
  0xa1   : > { %v1474_v19 = vsel %vm421_vm8, %v409_v11, %v420_v17  ;;  %432 = vst [vmem:[#allocation2 + $0x50] sm:$0xf] %v423_v18  ;;  %v413_v20 = vpop.permute.xlu0 %412  ;;  %v415_v21 = vpop.permute.xlu1 %414  ;;  %716 = vmatpush1.bf16.msra.mxu0 %v1174_v3  ;;  %v553_v22 = vld [vmem:[#allocation2 + $0x30] sm:$0xff] }
  0xa2   : > { %v418_v23 = vrot.slane %v413_v20, 4  ;;  %v419_v24 = vrot.slane %v415_v21, 4  ;;  %v1178_v25 = vcombine.high %v553_v22, %v398_v10  ;;  %v1177_v26 = vcombine.low %v553_v22, %v398_v10 }
  0xa4   : > { %v424_v27 = vsel %vm338_vm5, %v418_v23, %v419_v24  ;;  %v426_v28 = vsel %vm421_vm8, %v415_v21, %v419_v24  ;;  %v1280_v29 = vld [vmem:[#allocation2 + $0x38] ss:$12 sps:$4 sm:$0xff]   ;;  %717 = vmatprep.subr.bf16.mxu0 %v1178_v25 }
  0xa5   : > { %v425_v30 = vsel %vm421_vm8, %v413_v20, %v424_v27  ;;  %434 = vst [vmem:[#allocation2 + $0x5c] sm:$0x3] %v426_v28  ;;  %v436_v31 = vpop.permute.xlu0 %435  ;;  %v438_v32 = vpop.permute.xlu1 %437  ;;  %718 = vmatpush1.bf16.msra.mxu0 %v1177_v26  ;;  %1220 = vmatpush3.bf16.msra.mxu1 %v1280_v29 }
  0xa6   : > { %433 = vst [vmem:[#allocation2 + $0x54] sm:$0x33] %v425_v30  ;;  %v443_v33 = vrot.slane %v436_v31, 4  ;;  %v444_v34 = vrot.slane %v438_v32, 4  ;;  %1221 = vmatprep.subr.bf16.mxu1 %v1326_v12 }
  0xa8   : > { %v447_v35 = vsel %vm338_vm5, %v443_v33, %v444_v34  ;;  %v450_v36 = vsel %vm448_vm9, %v438_v32, %v444_v34 }
  0xa9   : > { %v449_v37 = vsel %vm448_vm9, %v436_v31, %v447_v35  ;;  %459 = vst [vmem:[#allocation2 + $0x5c] sm:$0xc] %v450_v36  ;;  %v440_v38 = vpop.permute.xlu0 %439  ;;  %v442_v39 = vpop.permute.xlu1 %441 }
  0xaa   : > { %458 = vst [vmem:[#allocation2 + $0x54] sm:$0xcc] %v449_v37  ;;  %v445_v40 = vrot.slane %v440_v38, 4  ;;  %v446_v41 = vrot.slane %v442_v39, 4 }
  0xac   : > { %v451_v42 = vsel %vm338_vm5, %v445_v40, %v446_v41  ;;  %v453_v43 = vsel %vm448_vm9, %v442_v39, %v446_v41  ;;  %v1285_v41 = vld [vmem:[%s1542_s1] sm:$0xff]  }
  0xad   : > { %v452_v44 = vsel %vm448_vm9, %v440_v38, %v451_v42  ;;  %461 = vst [vmem:[#allocation2 + $0x68] sm:$0xf] %v453_v43  ;;  %v463_v45 = vpop.permute.xlu0 %462  ;;  %v465_v46 = vpop.permute.xlu1 %464 }
  0xae   : > { %v470_v47 = vrot.slane %v463_v45, 4  ;;  %v471_v48 = vrot.slane %v465_v46, 4 }
  0xb0   : > { %v474_v49 = vsel %vm338_vm5, %v470_v47, %v471_v48  ;;  %v477_v50 = vsel %vm475_vm10, %v465_v46, %v471_v48  ;;  %v1281_v51 = vld [vmem:[#allocation2 + $0x50] ss:$12 sps:$4 sm:$0xff]  }
  0xb1   : > { %v476_v52 = vsel %vm475_vm10, %v463_v45, %v474_v49  ;;  %486 = vst [vmem:[#allocation2 + $0x74] sm:$0xf] %v477_v50  ;;  %v467_v53 = vpop.permute.xlu0 %466  ;;  %v469_v54 = vpop.permute.xlu1 %468  ;;  %v559_v55 = vld [vmem:[#allocation2 + $0x54] sm:$0xff]  ;;  %1222 = vmatpush3.bf16.msra.mxu1 %v1281_v51 }
  0xb2   : > { %v472_v56 = vrot.slane %v467_v53, 4  ;;  %v473_v57 = vrot.slane %v469_v54, 4  ;;  %v1181_v58 = vcombine.high %v1474_v19, %v559_v55  ;;  %v1180_v59 = vcombine.low %v1474_v19, %v559_v55  ;;  %1223 = vmatprep.subr.bf16.mxu1 %v1326_v12 }
  0xb3   : > { %v1184_v62 = vcombine.high %v452_v44, %v476_v52  ;;  %v1183_v5 = vcombine.low %v452_v44, %v476_v52 }
  0xb4   : > { %v478_v60 = vsel %vm338_vm5, %v472_v56, %v473_v57  ;;  %v480_v61 = vsel %vm475_vm10, %v469_v54, %v473_v57  ;;  %719 = vmatprep.subr.bf16.mxu0 %v1181_v58 }
  0xb5   : > { %v479_v63 = vsel %vm475_vm10, %v467_v53, %v478_v60  ;;  %488 = vst [vmem:[#allocation2 + $0x80] sm:$0x3] %v480_v61  ;;  %v490_v0 = vpop.permute.xlu0 %489  ;;  %v492_v1 = vpop.permute.xlu1 %491  ;;  %720 = vmatpush1.bf16.msra.mxu0 %v1180_v59 }
  0xb6   : > { %487 = vst [vmem:[#allocation2 + $0x78] sm:$0x33] %v479_v63  ;;  %v497_v2 = vrot.slane %v490_v0, 4  ;;  %v498_v4 = vrot.slane %v492_v1, 4  ;;  %721 = vmatprep.subr.bf16.mxu0 %v1184_v62 }
  0xb8   : > { %v501_v6 = vsel %vm338_vm5, %v497_v2, %v498_v4  ;;  %v504_v7 = vsel %vm502_vm11, %v492_v1, %v498_v4  ;;  %v1282_v8 = vld [vmem:[#allocation2 + $0x68] ss:$12 sps:$4 sm:$0xff]  }
  0xb9   : > { %v503_v9 = vsel %vm502_vm11, %v490_v0, %v501_v6  ;;  %513 = vst [vmem:[#allocation2 + $0x80] sm:$0xc] %v504_v7  ;;  %v494_v10 = vpop.permute.xlu0 %493  ;;  %v496_v11 = vpop.permute.xlu1 %495  ;;  %722 = vmatpush1.bf16.msra.mxu0 %v1183_v5  ;;  %1224 = vmatpush3.bf16.msra.mxu1 %v1282_v8  ;;  %v1287_v4 = vld [vmem:[%s1544_s3 + $0x8] sm:$0xff]  }
  0xba   : > { %512 = vst [vmem:[#allocation2 + $0x78] sm:$0xcc] %v503_v9  ;;  %v499_v13 = vrot.slane %v494_v10, 4  ;;  %v500_v15 = vrot.slane %v496_v11, 4  ;;  %1225 = vmatprep.subr.bf16.mxu1 %v1326_v12 }
  0xbc   : > { %v505_v16 = vsel %vm338_vm5, %v499_v13, %v500_v15  ;;  %v507_v3 = vsel %vm502_vm11, %v496_v11, %v500_v15 }
  0xbd   : > { %v506_v17 = vsel %vm502_vm11, %v494_v10, %v505_v16  ;;  %515 = vst [vmem:[#allocation2 + $0x8c] sm:$0xf] %v507_v3  ;;  %v517_v18 = vpop.permute.xlu0 %516  ;;  %v519_v19 = vpop.permute.xlu1 %518 }
  0xbe   : > { %v524_v20 = vrot.slane %v517_v18, 4  ;;  %v525_v21 = vrot.slane %v519_v19, 4 }
  0xc0   : > { %v528_v22 = vsel %vm338_vm5, %v524_v20, %v525_v21  ;;  %v531_v23 = vsel %vm529_vm12, %v519_v19, %v525_v21 }
  0xc1   : > { %v530_v24 = vsel %vm529_vm12, %v517_v18, %v528_v22  ;;  %540 = vst [vmem:[#allocation2 + $0x98] sm:$0xf] %v531_v23  ;;  %v521_v25 = vpop.permute.xlu0 %520  ;;  %v523_v26 = vpop.permute.xlu1 %522  ;;  %v565_v27 = vld [vmem:[#allocation2 + $0x78] sm:$0xff] }
  0xc2   : > { %v526_v28 = vrot.slane %v521_v25, 4  ;;  %v527_v29 = vrot.slane %v523_v26, 4  ;;  %v1187_v30 = vcombine.high %v565_v27, %v506_v17  ;;  %v1186_v31 = vcombine.low %v565_v27, %v506_v17 }
  0xc4   : > { %v532_v32 = vsel %vm338_vm5, %v526_v28, %v527_v29  ;;  %v534_v33 = vsel %vm529_vm12, %v523_v26, %v527_v29  ;;  %v1283_v34 = vld [vmem:[#allocation2 + $0x80] ss:$12 sps:$4 sm:$0xff]   ;;  %723 = vmatprep.subr.bf16.mxu0 %v1187_v30 }
  0xc5   : > { %v533_v35 = vsel %vm529_vm12, %v521_v25, %v532_v32  ;;  %542 = vst [vmem:[#allocation2 + $0xa4] sm:$0x3] %v534_v33  ;;  %724 = vmatpush1.bf16.msra.mxu0 %v1186_v31  ;;  %1226 = vmatpush3.bf16.msra.mxu1 %v1283_v34 }
  0xc6   : > { %541 = vst [vmem:[#allocation2 + $0x9c] sm:$0x33] %v533_v35  ;;  %1227 = vmatprep.subr.bf16.mxu1 %v1326_v12  ;;  %v1286_v12 = vld [vmem:[%s1544_s3] sm:$0xff]  }
  0xcc   : > { %v1284_v36 = vld [vmem:[#allocation2 + $0x98] ss:$12 sps:$4 sm:$0x3f]  }
  0xcd   : > { %v571_v37 = vld [vmem:[#allocation2 + $0x9c] sm:$0x33]  ;;  %v711_v39 = vsel %vm703_vm13, %v1284_v36, 0 }
  0xce   : > { %v1190_v38 = vcombine.high %v530_v24, %v571_v37  ;;  %v1189_v40 = vcombine.low %v530_v24, %v571_v37  ;;  %1228 = vmatpush3.bf16.msra.mxu1 %v711_v39 }
  0xd0   : > { %1192 = vmatprep.subr.msk.bf16.mxu0 %vm703_vm13, %v1190_v38  ;;  %v705_v42 = vsel %vm703_vm13, %v1189_v40, 0 }
  0xd1   : > { %726 = vmatpush1.bf16.msra.mxu0 %v705_v42  ;;  %1230 = vmatmul.mubr.msk.bf16.vlgmr.msra.gmra.mrb[0].mxu1 %vm448_vm9, %v1285_v41 }
  0xd2   : > { %1235 = vmatprep.mubr.msk.bf16.mxu1 %vm844_vm14, %v1286_v12  ;;  %v578_v43 = vpop.permute.xlu0 %577  ;;  %v583_v45 = vpop.permute.xlu1 %582 }
  0xd4   : > { %1193 = vmatmul.mubr.msk.bf16.vlgmr.msra.gmra.mrb[0].mxu0 %vm448_vm9, %v1285_v41 }
  0xd5   : > { %883 = vmatprep.mubr.bf16.mxu0 %v1334_v14 }
  0xd6   : > { %v817_v6 = vpop.permute.xlu1 %816  ;;  %v822_v7 = vpop.permute.xlu0 %821 }
  0xda   : > { %v827_v8 = vpop.permute.xlu1 %826  ;;  %v832_v9 = vpop.permute.xlu0 %831 }
  0xde   : > { %v972_v13 = vpop.permute.xlu1 %971 }
  0xe2   : > { %v982_v37 = vpop.permute.xlu1 %981 }
 0x1a4   : > { %v790_v44 = vpop.f32.mrb[0].mxu1 }
 0x1a5   : > { %v791_v46 = vadd.f32 %v790_v44, %v578_v43  ;;  %v1231_v47 = vpop.f32.mrb[1].mxu1 }
 0x1a6   : > { %v793_v49 = vpop.f32.mrb[2].mxu1 }
 0x1a7   : > { %v747_v48 = vpop.f32.mrb[0].mxu0  ;;  %v799_v50 = vmax.f32 %v791_v46, 0.0  ;;  %v794_v53 = vadd.f32 %v793_v49, %v583_v45  ;;  %v1232_v54 = vpop.f32.mrb[3].mxu1 }
 0x1a8   : > { %v748_v51 = vadd.f32 %v747_v48, %v578_v43  ;;  %v749_v52 = vpop.f32.mrb[1].mxu0  ;;  %v1034_v54 = vlaneseq }
 0x1a9   : > { %v750_v55 = vadd.f32 %v749_v52, %v578_v43  ;;  %v751_v56 = vpop.f32.mrb[2].mxu0  ;;  %v802_v57 = vmax.f32 %v794_v53, 0.0 }
 0x1aa   : > { %v752_v58 = vadd.f32 %v751_v56, %v583_v45  ;;  %v753_v59 = vpop.f32.mrb[3].mxu0  ;;  %v797_v61 = vmax.f32 %v748_v51, 0.0  ;;  %vm1085_vm15 = vcmp.lt.s32.totalorder %v1034_v54, 384 }
 0x1ab   : > { %v754_v60 = vadd.f32 %v753_v59, %v583_v45  ;;  %v809_v62 = vpack.c.bf16 %v802_v57, %v799_v50  ;;  %v798_v0 = vmax.f32 %v750_v55, 0.0 }
 0x1ac   : > { %v800_v63 = vmax.f32 %v752_v58, 0.0 }
 0x1ad   : > { %v801_v1 = vmax.f32 %v754_v60, 0.0  ;;  %1233 = vmatprep.subr.bf16.mxu1 %v809_v62 }
 0x1ae   : > { %v807_v2 = vpack.c.bf16 %v800_v63, %v797_v61  ;;  %1234 = vmatpush3.bf16.msra.mxu1 %v809_v62 }
 0x1af   : > { %v808_v5 = vpack.c.bf16 %v801_v1, %v798_v0 }
 0x1b1   : > { %851 = vmatprep.subr.bf16.mxu0 %v808_v5  ;;  %1236 = vmatmul.mubr.msk.bf16.vlgmr.msra.gmra.mrb[4].mxu1 %vm844_vm14, %v1287_v4 }
 0x1b2   : > { %852 = vmatpush1.bf16.msra.mxu0 %v807_v2  ;;  %v1035_v2 = vshrl.u32 %v1034_v54, 7 }
 0x1b5   : > { %1197 = vmatmul.mubr.msk.bf16.vlgmr.msra.gmra.mrb[4].mxu0 %vm844_vm14, %v1286_v12 }
 0x1b6   : > { %893 = vmatprep.mubr.bf16.mxu0 %v1334_v14  ;;  %v977_v14 = vpop.permute.xlu0 %976 }
 0x1ba   : > { %v987_v12 = vpop.permute.xlu0 %986 }
 0x1bd   : > { %1198 = vmatmul.mubr.msk.bf16.gmra.mrb[8].mxu0 %vm844_vm14, %v1287_v4 }
 0x284   : > { %v1237_v10 = vpop.f32.mrb[4].mxu1 }
 0x285   : > { %v938_v11 = vpop.f32.mrb[5].mxu1  ;;  %v947_v15 = vadd.f32 %v1237_v10, %v827_v8 }
 0x286   : > { %v939_v16 = vadd.f32 %v938_v11, %v817_v6  ;;  %v1238_v3 = vpop.f32.mrb[6].mxu1 }
 0x287   : > { %v941_v18 = vpop.f32.mrb[7].mxu1  ;;  %v950_v21 = vadd.f32 %v1238_v3, %v832_v9  ;;  %v961_v26 = vmax.f32 %v947_v15, 0.0  ;;  %v1036_v15 = vsub.s32 0, %v1035_v2 }
 0x288   : > { %v885_v17 = vpop.f32.mrb[4].mxu0  ;;  %v955_v19 = vmax.f32 %v939_v16, 0.0  ;;  %v942_v23 = vadd.f32 %v941_v18, %v822_v7 }
 0x289   : > { %v886_v20 = vadd.f32 %v885_v17, %v817_v6  ;;  %v887_v22 = vpop.f32.mrb[5].mxu0  ;;  %v964_v34 = vmax.f32 %v950_v21, 0.0  ;;  %v997_v39 = vmul.f32 %v982_v37, %v961_v26  ;;  %v1032_v17 = vpop.permute.xlu1 %1031 }
 0x28a   : > { %v888_v24 = vadd.f32 %v887_v22, %v817_v6  ;;  %v889_v25 = vpop.f32.mrb[6].mxu0  ;;  %v958_v28 = vmax.f32 %v942_v23, 0.0  ;;  %v991_v33 = vmul.f32 %v972_v13, %v955_v19  ;;  %v1037_v21 = vrot.slane %v1032_v17, %v1036_v15 }
 0x28b   : > { %v953_v27 = vmax.f32 %v886_v20, 0.0  ;;  %v890_v29 = vadd.f32 %v889_v25, %v822_v7  ;;  %v891_v30 = vpop.f32.mrb[7].mxu0  ;;  %v1000_v46 = vmul.f32 %v987_v12, %v964_v34 }
 0x28c   : > { %v954_v31 = vmax.f32 %v888_v24, 0.0  ;;  %v892_v32 = vadd.f32 %v891_v30, %v822_v7  ;;  %v994_v35 = vmul.f32 %v977_v14, %v958_v28 }
 0x28d   : > { %v956_v36 = vmax.f32 %v890_v29, 0.0  ;;  %v989_v40 = vmul.f32 %v972_v13, %v953_v27 }
 0x28e   : > { %v957_v38 = vmax.f32 %v892_v32, 0.0  ;;  %v1019_v41 = vadd.f32 %v994_v35, %v991_v33  ;;  %v990_v43 = vmul.f32 %v972_v13, %v954_v31 }
 0x28f   : > { %v992_v42 = vmul.f32 %v977_v14, %v956_v36 }
 0x290   : > { %v993_v44 = vmul.f32 %v977_v14, %v957_v38  ;;  %v895_v45 = vpop.f32.mrb[8].mxu0  ;;  %v1020_v47 = vadd.f32 %v1019_v41, %v997_v39 }
 0x291   : > { %v1001_v48 = vadd.f32 %v992_v42, %v989_v40  ;;  %v896_v49 = vadd.f32 %v895_v45, %v827_v8  ;;  %v897_v50 = vpop.f32.mrb[9].mxu0 }
 0x292   : > { %v1010_v51 = vadd.f32 %v993_v44, %v990_v43  ;;  %v898_v52 = vadd.f32 %v897_v50, %v827_v8  ;;  %v899_v53 = vpop.f32.mrb[10].mxu0  ;;  %v1021_v55 = vadd.f32 %v1020_v47, %v1000_v46  ;;  %v1335_v44 = vmov 1966171168  }
 0x293   : > { %v959_v56 = vmax.f32 %v896_v49, 0.0  ;;  %v900_v57 = vadd.f32 %v899_v53, %v832_v9  ;;  %v901_v58 = vpop.f32.mrb[11].mxu0  ;;  %v1061_v45 = vunpack.c.l.s4 %v1335_v44 }
 0x294   : > { %v960_v59 = vmax.f32 %v898_v52, 0.0  ;;  %v902_v60 = vadd.f32 %v901_v58, %v832_v9  ;;  %v1022_v61 = vrot.slane %v1021_v55, 4 }
 0x295   : > { %v995_v62 = vmul.f32 %v982_v37, %v959_v56  ;;  %v962_v63 = vmax.f32 %v900_v57, 0.0  ;;  %v1062_v46 = vunpack.c.0.s8 %v1061_v45 }
 0x296   : > { %v996_v0 = vmul.f32 %v982_v37, %v960_v59  ;;  %v963_v1 = vmax.f32 %v902_v60, 0.0  ;;  %v1023_v4 = vadd.f32 %v1022_v61, %v1021_v55 }
 0x297   : > { %v1002_v5 = vadd.f32 %v1001_v48, %v995_v62  ;;  %v998_v6 = vmul.f32 %v987_v12, %v962_v63  ;;  %v1065_v49 = vsub.s32 %v1062_v46, %v1035_v2 }
 0x298   : > { %v1011_v7 = vadd.f32 %v1010_v51, %v996_v0  ;;  %v999_v8 = vmul.f32 %v987_v12, %v963_v1  ;;  %v1024_v10 = vrot.slane %v1023_v4, 2 }
 0x299   : > { %v1003_v11 = vadd.f32 %v1002_v5, %v998_v6 }
 0x29a   : > { %v1012_v13 = vadd.f32 %v1011_v7, %v999_v8  ;;  %v1025_v16 = vadd.f32 %v1024_v10, %v1023_v4 }
 0x29b   : > { %v1004_v3 = vrot.slane %v1003_v11, 4 }
 0x29c   : > { %v1013_v9 = vrot.slane %v1012_v13, 4  ;;  %v1026_v18 = vrot.slane %v1025_v16, 1 }
 0x29d   : > { %v1005_v19 = vadd.f32 %v1004_v3, %v1003_v11 }
 0x29e   : > { %v1014_v20 = vadd.f32 %v1013_v9, %v1012_v13  ;;  %v1027_v22 = vadd.f32 %v1026_v18, %v1025_v16 }
 0x29f   : > { %v1006_v23 = vrot.slane %v1005_v19, 2 }
 0x2a0   : > { %v1015_v14 = vrot.slane %v1014_v20, 2  ;;  %v1040_v24 = vadd.f32 %v1037_v21, %v1027_v22 }
 0x2a1   : > { %v1007_v25 = vadd.f32 %v1006_v23, %v1005_v19 }
 0x2a2   : > { %v1016_v26 = vadd.f32 %v1015_v14, %v1014_v20  ;;  %v1043_v27 = vsub.f32 0.0, %v1040_v24 }
 0x2a3   : > { %v1008_v28 = vrot.slane %v1007_v25, 1 }
 0x2a4   : > { %v1017_v29 = vrot.slane %v1016_v26, 1  ;;  %v1048_v30 = vmul.f32 1.442695, %v1043_v27 }
 0x2a5   : > { %v1009_v31 = vadd.f32 %v1008_v28, %v1007_v25 }
 0x2a6   : > { %v1018_v32 = vadd.f32 %v1017_v29, %v1016_v26  ;;  %1288 = vpow2.f32 %v1048_v30 }
 0x2a7   : > { %v1038_v33 = vadd.f32 %v1037_v21, %v1009_v31 }
 0x2a8   : > { %v1039_v34 = vadd.f32 %v1037_v21, %v1018_v32 }
 0x2a9   : > { %v1041_v35 = vsub.f32 0.0, %v1038_v33 }
 0x2aa   : > { %v1042_v36 = vsub.f32 0.0, %v1039_v34 }
 0x2ab   : > { %v1044_v37 = vmul.f32 1.442695, %v1041_v35 }
 0x2ac   : > { %v1046_v38 = vmul.f32 1.442695, %v1042_v36 }
 0x2ad   : > { %1290 = vpow2.f32 %v1044_v37 }
 0x2ae   : > { %1292 = vpow2.f32 %v1046_v38 }
 0x2b0   : > { %v1289_v39 = vpop.eup %1288 }
 0x2b1   : > { %v1052_v40 = vadd.f32 1.0, %v1289_v39 }
 0x2b3   : > { %1294 = vrcp.f32 %v1052_v40 }
 0x2b7   : > { %v1291_v41 = vpop.eup %1290 }
 0x2b8   : > { %v1293_v42 = vpop.eup %1292  ;;  %v1050_v12 = vadd.f32 1.0, %v1291_v41 }
 0x2b9   : > { %v1051_v43 = vadd.f32 1.0, %v1293_v42 }
 0x2ba   : > { %1296 = vrcp.f32 %v1050_v12 }
 0x2bb   : > { %1298 = vrcp.f32 %v1051_v43 }
 0x2bd   : > { %v1295_v47 = vpop.eup %1294 }
 0x2be   : > { %v1073_v52 = vrot.slane %v1295_v47, %v1065_v49 }
 0x2c4   : > { %v1297_v48 = vpop.eup %1296 }
 0x2c5   : > { %v1299_v50 = vpop.eup %1298 }
 0x2c6   : > { %v1059_v51 = vcombine.low %v1297_v48, %v1299_v50 }
 0x2c8   : > { %v1066_v53 = vrot.slane %v1059_v51, %v1065_v49 }
 0x2ca   : > { %v1074_v55 = vcombine.low %v1066_v53, %v1073_v52 }
 0x2cc   : > { %v1081_v56 = vrot.slane %v1074_v55, %v1065_v49 }
 0x2ce   : > { %1087 = vst.msk [vmem:[%s300_s30] sm:$0x7] %vm1085_vm15, %v1081_v56 }
 0x2cf PF: > { %s19_s28 = sadd.s32 1, %s1322_s28   ;;  %s1549_s26 = smov %s1318_s27 }
 0x2d0   : > { %p16_p5 = scmp.ge.s32.totalorder %s19_s28, 4   ;;  %s1550_s27 = smov %s1552_s6 }
 0x2d2   :  { %18 = sbr.rel (!%p16_p5) target bundleno = 3 (0x3), region = 78 }

</bundles_post_ra>
